<compile_context>
chip_gen: v7x
topology: tpu7x:2x2x1
jax: 0.10.0
libtpu: 0.0.40
codegen_flags: <defaults>
</compile_context>

<pallas_src>
import functools

import jax
import jax.numpy as jnp
from jax.experimental import pallas as pl
from jax.experimental.pallas import tpu as pltpu

BN_EPS = 1e-5
LANE = 128


def _round_up(n, m):
    return (n + m - 1) // m * m


def _embedding_kernel(x_ref, w_ref, gb_ref, out_ref):
    # Linear (bias dropped: it cancels under training-mode BatchNorm).
    # bf16 x bf16 on the MXU with f32 accumulation.
    y = jnp.dot(x_ref[...], w_ref[...], preferred_element_type=jnp.float32)

    # BatchNorm1d training-mode forward: batch mean, biased batch variance (f32).
    mean = jnp.mean(y, axis=0, keepdims=True)                 # (1, out_pad)
    centered = y - mean
    var = jnp.mean(centered * centered, axis=0, keepdims=True)
    inv_std = jax.lax.rsqrt(var + BN_EPS)                     # EUP rsqrt

    gamma = gb_ref[0:1, :]                                    # (1, out_pad) f32
    beta = gb_ref[1:2, :]
    # Fold inv_std * gamma at (1, out_pad) width before the (B, out_pad) multiply.
    y_bn = centered * (inv_std * gamma) + beta

    # ReLU + store (lane-dense: out_pad is a multiple of 128).
    out_ref[...] = jnp.maximum(y_bn, 0.0).astype(out_ref.dtype)


def prepare_params(w, b, gamma, beta):
    """One-time parameter prep, hoisted out of the per-call path.

    w: (out_feat, in_feat), b: (out_feat,) [unused: cancels under BN],
    gamma/beta: (out_feat,).
    Returns (w_t, gb, out_feat):
      w_t: (in_feat, out_pad) bf16, zero-padded, pre-transposed.
      gb : (2, out_pad) f32, row 0 = gamma (padded with 1.0), row 1 = beta (0.0).
    """
    del b  # Linear bias is a no-op under training-mode BatchNorm.
    out_feat, in_feat = w.shape
    out_pad = _round_up(out_feat, LANE)

    w_t = jnp.zeros((in_feat, out_pad), jnp.bfloat16)
    w_t = w_t.at[:, :out_feat].set(jnp.transpose(w).astype(jnp.bfloat16))

    gb = jnp.zeros((2, out_pad), jnp.float32)
    gb = gb.at[0, :out_feat].set(gamma.astype(jnp.float32))
    gb = gb.at[1, :out_feat].set(beta.astype(jnp.float32))
    gb = gb.at[0, out_feat:].set(1.0)  # padded columns stay exactly zero

    return w_t, gb, out_feat


@functools.partial(jax.jit, static_argnames=("out_feat",))
def embedding_module_apply(x, w_t, gb, *, out_feat):
    """x: (B, *) — flattened to (B, in_feat) as in the PyTorch forward."""
    B = x.shape[0]
    x2 = x.reshape(B, -1).astype(jnp.bfloat16)   # view(B, -1); bf16 -> MXU
    in_feat = x2.shape[1]
    out_pad = w_t.shape[1]
    assert w_t.shape[0] == in_feat

    vmem = pl.BlockSpec(memory_space=pltpu.MemorySpace.VMEM)

    out_padded = pl.pallas_call(
        _embedding_kernel,
        out_shape=jax.ShapeDtypeStruct((B, out_pad), jnp.float32),
        in_specs=[vmem, vmem, vmem],
        out_specs=vmem,
    )(x2, w_t, gb)

    return out_padded[:, :out_feat]


if __name__ == "__main__":
    key = jax.random.PRNGKey(0)
    k_x, k_w, k_b, k_g, k_bt = jax.random.split(key, 5)

    B, C, N = 8, 4, 8            # input (B, 4, 8) -> flattened in_feat = 32
    in_feat = C * N
    out_feat = 64

    x = jax.random.normal(k_x, (B, C, N), dtype=jnp.float32)
    # Deterministic, PyTorch-shaped parameters (synthetic init).
    bound = 1.0 / jnp.sqrt(in_feat)
    w = jax.random.uniform(k_w, (out_feat, in_feat), jnp.float32, -bound, bound)
    b = jax.random.uniform(k_b, (out_feat,), jnp.float32, -bound, bound)
    gamma = 1.0 + 0.1 * jax.random.normal(k_g, (out_feat,), jnp.float32)
    beta = 0.1 * jax.random.normal(k_bt, (out_feat,), jnp.float32)

    w_t, gb, of = prepare_params(w, b, gamma, beta)
    out = embedding_module_apply(x, w_t, gb, out_feat=of)
    out = jax.block_until_ready(out)

    # Reference fed with the same bf16-rounded operands the kernel sees
    # (upcast to f32).  The Linear bias IS included here to demonstrate that
    # dropping it in the kernel is exact under training-mode BatchNorm.
    x_bf = x.reshape(B, -1).astype(jnp.bfloat16).astype(jnp.float32)
    w_bf = w.astype(jnp.bfloat16).astype(jnp.float32)
    y = x_bf @ w_bf.T + b
    mean = jnp.mean(y, axis=0, keepdims=True)
    var = jnp.mean((y - mean) ** 2, axis=0, keepdims=True)
    ref = jnp.maximum((y - mean) / jnp.sqrt(var + BN_EPS) * gamma + beta, 0.0)

    assert out.shape == (B, out_feat)
    assert jnp.allclose(out, ref, atol=1e-3, rtol=1e-3), "mismatch vs reference"

    print("KERNEL_OK")
</pallas_src>

<mosaic_0001>
module attributes {stable_mosaic.version = 11 : i64} {
  func.func @_embedding_kernel(%arg0: memref<8x32xbf16, #tpu.memory_space<vmem>>, %arg1: memref<32x128xbf16, #tpu.memory_space<vmem>>, %arg2: memref<2x128xf32, #tpu.memory_space<vmem>>, %arg3: memref<8x128xf32, #tpu.memory_space<vmem>>) attributes {dimension_semantics = [], scalar_prefetch = 0 : i64, scratch_operands = 0 : i64, tpu.core_type = #tpu.core_type<tc>} {
    %c0 = arith.constant 0 : index
    %c0_0 = arith.constant 0 : index
    %0 = vector.load %arg0[%c0, %c0_0] : memref<8x32xbf16, #tpu.memory_space<vmem>>, vector<8x32xbf16>
    %c0_1 = arith.constant 0 : index
    %c0_2 = arith.constant 0 : index
    %1 = vector.load %arg1[%c0_1, %c0_2] : memref<32x128xbf16, #tpu.memory_space<vmem>>, vector<32x128xbf16>
    %cst = arith.constant dense<0.000000e+00> : vector<8x128xf32>
    %2 = tpu.matmul %0, %1, %cst {dimension_numbers = #tpu.dot_dimension_numbers<[1], [0], [0], [1], [0, 0, 1, 1], [], []>} : vector<8x32xbf16>, vector<32x128xbf16>, vector<8x128xf32> -> vector<8x128xf32>
    %cst_3 = arith.constant dense<0.000000e+00> : vector<128xf32>
    %3 = vector.multi_reduction <add>, %2, %cst_3 [0] : vector<8x128xf32> to vector<128xf32>
    %4 = vector.shape_cast %3 : vector<128xf32> to vector<1x128xf32>
    %cst_4 = arith.constant 8.000000e+00 : f32
    %5 = vector.broadcast %cst_4 : f32 to vector<1x128xf32>
    %6 = arith.divf %4, %5 : vector<1x128xf32>
    %7 = vector.broadcast %6 : vector<1x128xf32> to vector<8x128xf32>
    %8 = arith.subf %2, %7 : vector<8x128xf32>
    %9 = arith.mulf %8, %8 : vector<8x128xf32>
    %cst_5 = arith.constant dense<0.000000e+00> : vector<128xf32>
    %10 = vector.multi_reduction <add>, %9, %cst_5 [0] : vector<8x128xf32> to vector<128xf32>
    %11 = vector.shape_cast %10 : vector<128xf32> to vector<1x128xf32>
    %cst_6 = arith.constant 8.000000e+00 : f32
    %12 = vector.broadcast %cst_6 : f32 to vector<1x128xf32>
    %13 = arith.divf %11, %12 : vector<1x128xf32>
    %cst_7 = arith.constant 9.99999974E-6 : f32
    %14 = vector.broadcast %cst_7 : f32 to vector<1x128xf32>
    %15 = arith.addf %13, %14 : vector<1x128xf32>
    %16 = math.rsqrt %15 : vector<1x128xf32>
    %c0_8 = arith.constant 0 : index
    %c0_9 = arith.constant 0 : index
    %17 = vector.load %arg2[%c0_8, %c0_9] : memref<2x128xf32, #tpu.memory_space<vmem>>, vector<1x128xf32>
    %c1 = arith.constant 1 : index
    %c0_10 = arith.constant 0 : index
    %18 = vector.load %arg2[%c1, %c0_10] : memref<2x128xf32, #tpu.memory_space<vmem>>, vector<1x128xf32>
    %19 = arith.mulf %16, %17 : vector<1x128xf32>
    %20 = vector.broadcast %19 : vector<1x128xf32> to vector<8x128xf32>
    %21 = arith.mulf %8, %20 : vector<8x128xf32>
    %22 = vector.broadcast %18 : vector<1x128xf32> to vector<8x128xf32>
    %23 = arith.addf %21, %22 : vector<8x128xf32>
    %cst_11 = arith.constant 0.000000e+00 : f32
    %24 = vector.broadcast %cst_11 : f32 to vector<8x128xf32>
    %25 = arith.maximumf %23, %24 : vector<8x128xf32>
    %c0_12 = arith.constant 0 : index
    %c0_13 = arith.constant 0 : index
    %26 = vector.load %arg3[%c0_12, %c0_13] : memref<8x128xf32, #tpu.memory_space<vmem>>, vector<8x128xf32>
    tpu.vector_store %arg3[%c0_12, %c0_13], %25 {strides = array<i32>} : memref<8x128xf32, #tpu.memory_space<vmem>>, vector<8x128xf32>,
    return
  }
}

</mosaic_0001>

<bundles_post_ra>
// kernel: embedding_module_apply.1
= control target key start
LH: loop header
LB: loop body
LE: loop exit
PB: predicated region body
PF: predicated region fallthrough
CT: control target
= control target key end

     0   :  { %v171_v1 = vmov 0.0   ;;  %vm172_vm0 = vmmov 0   ;;  %s221_s0 = inlined_call_operand.vmem [shape: bf16[8,32], index: 0, kind: input, shape index: {}]   ;;  %s222_s1 = inlined_call_operand.vmem [shape: bf16[32,128], index: 1, kind: input, shape index: {}]   ;;  %s223_s2 = inlined_call_operand.vmem [shape: f32[2,128], index: 2, kind: input, shape index: {}]   ;;  %s224_s3 = inlined_call_operand.hbm [shape: f32[8,128], index: 3, kind: output, shape index: {}]  }
   0x1   :  { %v143_v0 = vld [vmem:[%s222_s1] sm:$0xff]   ;;  %132 = vmatprep.subr.bf16.mxu0 %v171_v1  ;;  %v144_v2 = vld [vmem:[%s222_s1 + $0x8] sm:$0xff]   ;;  %136 = vmatprep.mubr.msk.bf16.mxu0 %vm172_vm0, %v171_v1 }
   0x2   :  { %133 = vmatpush3.bf16.msra.mxu0 %v143_v0 }
   0x3   :  { %8 = vsyncpa [#allocation3], 0  ;;  %134 = vmatprep.subr.bf16.mxu0 %v171_v1  ;;  %v16_v3 = vld [vmem:[%s221_s0] sm:$0xf]  ;;  %vm33_vm1 = vcmask 261120   ;;  %v99_v25 = vlaneseq  ;;  %s173_s20 = smov [#allocation2]  }
   0x4   :  { %v96_v27 = vld [vmem:[%s223_s2] sm:$0x1]  ;;  %v128_v32 = vld [vmem:[%s223_s2 + $0x1] ss:$0 sm:$0xff]  ;;  %s117_s21 = sshll.u32 %s173_s20, 4  ;;  %s118_s21 = int_to_ptr.vmem [resolvable:$true] %s117_s21 }
   0x5   :  { %v100_v26 = vshrl.u32 %v99_v25, 7  ;;  %s147_s22 = scalar_lea.vmem %s118_s21, 128  ;;  %p152_p1 = scmp.lt.s32.totalorder %s118_s21, %s118_s21 }
   0x6   :  { %135 = vmatpush3.bf16.msra.mxu0 %v144_v2  ;;  %p148_p0 = scmp.ne.s32.totalorder %s118_s21, %s147_s22  ;;  %p153_p2 = scmp.lt.s32.totalorder %s147_s22, %s147_s22 }
   0x7   :  { %v101_v28 = vsub.s32 0, %v100_v26 }
   0x8   :  { %p154_p3 = por %p153_p2, %p152_p1 }
   0x9   :  { %137 = vmatmul.mubr.msk.bf16.vlgmr.msra.gmra.mrb[0].mxu0 %vm33_vm1, %v16_v3 }
   0xa   :  { %p155_p4 = pnand %p154_p3, %p148_p0 }
  0xdc   :  { %v71_v4 = vpop.f32.mrb[0].mxu0 }
  0xdd   :  { %v77_v5 = vrot.slane %v71_v4, 4  ;;  %v138_v6 = vpop.f32.mrb[1].mxu0 }
  0xde   :  { %v74_v7 = vpop.f32.mrb[2].mxu0 }
  0xdf   :  { %v78_v8 = vadd.f32 %v77_v5, %v71_v4  ;;  %v139_v9 = vpop.f32.mrb[3].mxu0 }
  0xe1   :  { %v79_v10 = vrot.slane %v78_v8, 2 }
  0xe3   :  { %v80_v11 = vadd.f32 %v79_v10, %v78_v8 }
  0xe5   :  { %v81_v12 = vrot.slane %v80_v11, 1 }
  0xe7   :  { %v82_v13 = vadd.f32 %v81_v12, %v80_v11 }
  0xe9   :  { %v84_v14 = vmul.f32 0.125, %v82_v13 }
  0xeb   :  { %v85_v15 = vsub.f32 %v71_v4, %v84_v14 }
  0xed   :  { %v86_v16 = vmul.f32 %v85_v15, %v85_v15 }
  0xef   :  { %v87_v17 = vrot.slane %v86_v16, 4 }
  0xf1   :  { %v88_v18 = vadd.f32 %v87_v17, %v86_v16 }
  0xf3   :  { %v89_v19 = vrot.slane %v88_v18, 2 }
  0xf5   :  { %v90_v20 = vadd.f32 %v89_v19, %v88_v18 }
  0xf7   :  { %v91_v21 = vrot.slane %v90_v20, 1 }
  0xf9   :  { %v92_v22 = vadd.f32 %v91_v21, %v90_v20 }
  0xfb   :  { %v93_v23 = vmul.f32 0.125, %v92_v22 }
  0xfd   :  { %v94_v24 = vadd.f32 1e-05, %v93_v23 }
  0xff   :  { %145 = vrsqrt.f32 %v94_v24 }
 0x109   :  { %v146_v29 = vpop.eup %145 }
 0x10a   :  { %v98_v30 = vmul.f32 %v146_v29, %v96_v27 }
 0x10c   :  { %v102_v31 = vrot.slane %v98_v30, %v101_v28 }
 0x10e   :  { %v103_v33 = vmul.f32 %v102_v31, %v85_v15 }
 0x110   :  { %v108_v34 = vadd.f32 %v128_v32, %v103_v33 }
 0x112   :  { %v109_v35 = vmax.f32 %v108_v34, 0.0 }
 0x114   :  { %110 = vst [vmem:[#allocation2] sm:$0xff] %v109_v35 }
 0x115   :  { %158 = shalt.err (!%p155_p4)
}
 0x116   :  { %s159_s25 = scalar_lea.hbm %s224_s3, 128 }
 0x117   :  { %p160_p5 = scmp.ne.s32.totalorder %s224_s3, %s159_s25  ;;  %p163_p6 = scmp.lt.u32.totalorder %s159_s25, %s224_s3 }
 0x119   :  { %p165_p7 = pnand %p163_p6, %p160_p5 }
 0x11b   :  { %168 = shalt.err (!%p165_p7)
}
 0x11c   :  { %120 = dma.vmem_to_hbm [thread:$0]  %s118_s21, 128, %s224_s3, [#allocation3]  }
 0x11d   :  { %169 = dma.done.wait [#allocation3], 128  }
 0x11e   :  { %170 = vsyncadd [#allocation3], 4294967168 }
 0x11f   :  { %124 = vsyncpa [#allocation3], 1 }

</bundles_post_ra>
